<compile_context>
chip_gen: v7x
topology: tpu7x:2x2x1
jax: 0.10.0
libtpu: 0.0.40
codegen_flags: <defaults>
</compile_context>

<pallas_src>
import functools

import jax
import jax.numpy as jnp
from jax.experimental import pallas as pl
from jax.experimental.pallas import tpu as pltpu


def _transition_kernel(x_ref, scale_ref, bias_ref, w_ref, o_ref, h_ref, *,
                       compute_dtype):
    # x_ref:     (1, K, ts)  input dtype    K = (2x2-pool phase, channel)
    # scale_ref: (K, 1)      f32            folded BN scale, phase-tiled
    # bias_ref:  (K, 1)      f32            folded BN bias,  phase-tiled
    # w_ref:     (tc, K)     compute dtype  1x1 conv weight, phase-tiled, *0.25
    # o_ref:     (1, tc, ts) out dtype      NCHW-ordered output tile
    # h_ref:     (K, ts)     compute dtype  scratch: relu(bn(x)), reused over ci
    @pl.when(pl.program_id(2) == 0)
    def _():
        x = x_ref[0].astype(jnp.float32)             # affine in f32 (v5e-safe)
        h = jnp.maximum(x * scale_ref[...] + bias_ref[...], 0.0)
        h_ref[...] = h.astype(compute_dtype)

    o_ref[0] = jnp.dot(w_ref[...], h_ref[...],
                       preferred_element_type=jnp.float32).astype(o_ref.dtype)


def _vmem_limit_bytes():
    cap = None
    try:
        cap = getattr(pltpu.get_tpu_info(), "vmem_capacity_bytes", None)
    except Exception:
        cap = None
    if not cap:
        cap = 64 * 1024 * 1024                      # conservative (v7x-sized)
    return int(min(cap * 3 // 4, 100 * 1024 * 1024))


def transition_block_pallas(x_nchw, gamma, beta, running_mean, running_var,
                            conv_weight, eps=1e-5, *,
                            input_dtype=jnp.bfloat16,
                            compute_dtype=jnp.bfloat16,
                            out_dtype=None):
    """TransitionBlock forward (eval mode, droprate=0).  NCHW in, NCHW out."""
    n, cin, h, w = x_nchw.shape
    cout = conv_weight.shape[0]
    assert h % 2 == 0 and w % 2 == 0, "avg_pool2d(2) needs even H, W"
    ho, wo = h // 2, w // 2
    s = ho * wo
    k = 4 * cin
    if out_dtype is None:
        out_dtype = x_nchw.dtype

    # ---- fold BN (eval) into a per-channel affine; tile 4x over pool phases
    scale = (gamma.astype(jnp.float32) /
             jnp.sqrt(running_var.astype(jnp.float32) + eps))
    bias = beta.astype(jnp.float32) - running_mean.astype(jnp.float32) * scale
    scale4 = jnp.tile(scale, 4).reshape(k, 1)
    bias4 = jnp.tile(bias, 4).reshape(k, 1)

    # 1x1 conv weight, 0.25 pool factor folded, phase-tiled along K: (Cout, K)
    w4 = jnp.tile(conv_weight[:, :, 0, 0].astype(jnp.float32) * 0.25,
                  (1, 4)).astype(compute_dtype)

    # ---- relayout x: NCHW -> (N, K, S), K index = (di*2 + dj)*Cin + c
    x4 = x_nchw.reshape(n, cin, ho, 2, wo, 2)
    x4 = jnp.transpose(x4, (0, 3, 5, 1, 2, 4))       # (N, 2, 2, Cin, Ho, Wo)
    x4 = x4.reshape(n, k, s).astype(input_dtype)

    # ---- generation-aware tile selection -----------------------------------
    x_b = jnp.dtype(input_dtype).itemsize
    c_b = jnp.dtype(compute_dtype).itemsize
    o_b = jnp.dtype(out_dtype).itemsize
    vmem_limit = _vmem_limit_bytes()
    budget = int(vmem_limit * 0.65)

    def cdiv(a, b):
        return -(-a // b)

    def fits(ts_, tc_):
        need = (2 * k * ts_ * x_b            # x block, double-buffered
                + 2 * tc_ * k * c_b          # weight block, double-buffered
                + 2 * tc_ * ts_ * o_b        # out block, double-buffered
                + tc_ * ts_ * 4              # f32 accumulator headroom
                + k * ts_ * c_b              # h scratch
                + 4 * k * 4)                 # scale / bias blocks
        return need <= budget

    # spatial tile candidates: full S, else lane-dense multiples of 128
    ts_cands = sorted({s} | set(range(128, min(512, s) + 1, 128)), reverse=True)
    ts_min = ts_cands[-1]

    # prefer keeping the whole weight resident (no Cout tiling)
    tc = cout
    if not fits(ts_min, cout):
        for c in (512, 384, 256, 128, 64, 32, 16, 8):   # rare fallback path
            if c < cout and fits(ts_min, c):
                tc = c
                break

    ts = ts_min
    for t in ts_cands:
        if fits(t, tc):
            ts = t
            break

    # ensure both TensorCores (v7x megacore) get at least one program
    if n * cdiv(s, ts) * cdiv(cout, tc) < 2 and s > 128:
        t_half = cdiv(cdiv(s, 2), 128) * 128
        if t_half < s and fits(t_half, tc):
            ts = t_half

    grid = (n, cdiv(s, ts), cdiv(cout, tc))
    kernel = functools.partial(_transition_kernel, compute_dtype=compute_dtype)

    out = pl.pallas_call(
        kernel,
        out_shape=jax.ShapeDtypeStruct((n, cout, s), out_dtype),
        grid_spec=pltpu.PrefetchScalarGridSpec(
            num_scalar_prefetch=0,
            grid=grid,
            in_specs=[
                pl.BlockSpec((1, k, ts), lambda b, si, ci: (b, 0, si)),
                pl.BlockSpec((k, 1), lambda b, si, ci: (0, 0)),
                pl.BlockSpec((k, 1), lambda b, si, ci: (0, 0)),
                pl.BlockSpec((tc, k), lambda b, si, ci: (ci, 0)),
            ],
            out_specs=pl.BlockSpec((1, tc, ts), lambda b, si, ci: (b, ci, si)),
            scratch_shapes=[pltpu.VMEM((k, ts), compute_dtype)],
        ),
        compiler_params=pltpu.CompilerParams(
            dimension_semantics=("parallel", "parallel", "arbitrary"),
            vmem_limit_bytes=vmem_limit),
    )(x4, scale4, bias4, w4)

    # (N, Cout, S) -> (N, Cout, Ho, Wo) : free reshape, already NCHW order.
    return out.reshape(n, cout, ho, wo)


def transition_block_reference(x_nchw, gamma, beta, running_mean, running_var,
                               conv_weight, eps=1e-5):
    """Pure-JAX reference (eval-mode BN), NCHW."""
    xn = (x_nchw - running_mean[None, :, None, None]) / jnp.sqrt(
        running_var[None, :, None, None] + eps)
    xn = xn * gamma[None, :, None, None] + beta[None, :, None, None]
    xr = jnp.maximum(xn, 0.0)
    wmat = conv_weight[:, :, 0, 0]                   # (Cout, Cin)
    conv = jnp.einsum('nchw,oc->nohw', xr, wmat)
    n, co, hh, ww = conv.shape
    conv = conv.reshape(n, co, hh // 2, 2, ww // 2, 2)
    return conv.mean(axis=(3, 5))


if __name__ == "__main__":
    key = jax.random.PRNGKey(0)
    k1, k2, k3, k4, k5, k6 = jax.random.split(key, 6)

    N, Cin, Cout, H, W = 2, 8, 4, 16, 16

    x = jax.random.normal(k1, (N, Cin, H, W), dtype=jnp.float32)
    gamma = jax.random.normal(k2, (Cin,), dtype=jnp.float32) * 0.1 + 1.0
    beta = jax.random.normal(k3, (Cin,), dtype=jnp.float32) * 0.1
    running_mean = jax.random.normal(k4, (Cin,), dtype=jnp.float32) * 0.1
    running_var = jnp.abs(jax.random.normal(k5, (Cin,), dtype=jnp.float32)) * 0.1 + 1.0
    conv_weight = jax.random.normal(k6, (Cout, Cin, 1, 1), dtype=jnp.float32) * 0.1

    ref = transition_block_reference(x, gamma, beta, running_mean, running_var,
                                     conv_weight)

    # f32 path: exact within f32 rounding.
    fwd_f32 = jax.jit(functools.partial(transition_block_pallas,
                                        input_dtype=jnp.float32,
                                        compute_dtype=jnp.float32))
    out_f32 = jax.block_until_ready(
        fwd_f32(x, gamma, beta, running_mean, running_var, conv_weight))
    assert out_f32.shape == (N, Cout, H // 2, W // 2), out_f32.shape
    assert jnp.allclose(out_f32, ref, atol=1e-4, rtol=1e-4), \
        float(jnp.max(jnp.abs(out_f32 - ref)))

    # bf16 activation + bf16 MXU path (default; f32 accumulation).
    fwd_bf16 = jax.jit(transition_block_pallas)
    out_bf16 = jax.block_until_ready(
        fwd_bf16(x, gamma, beta, running_mean, running_var, conv_weight))
    assert out_bf16.shape == (N, Cout, H // 2, W // 2), out_bf16.shape
    assert jnp.allclose(out_bf16, ref, atol=3e-2, rtol=5e-2), \
        float(jnp.max(jnp.abs(out_bf16 - ref)))

    print("KERNEL_OK")
</pallas_src>

<mosaic_0001>
module attributes {stable_mosaic.version = 11 : i64} {
  func.func @_transition_kernel(%arg0: i32, %arg1: i32, %arg2: i32, %arg3: memref<1x32x64xf32, #tpu.memory_space<vmem>>, %arg4: memref<32x1xf32, #tpu.memory_space<vmem>>, %arg5: memref<32x1xf32, #tpu.memory_space<vmem>>, %arg6: memref<4x32xf32, #tpu.memory_space<vmem>>, %arg7: memref<1x4x64xf32, #tpu.memory_space<vmem>>, %arg8: memref<32x64xf32, #tpu.memory_space<vmem>>) attributes {dimension_semantics = [#tpu.dimension_semantics<parallel>, #tpu.dimension_semantics<parallel>, #tpu.dimension_semantics<arbitrary>], iteration_bounds = array<i64: 2, 1, 1>, scalar_prefetch = 0 : i64, scratch_operands = 1 : i64, tpu.core_type = #tpu.core_type<tc>, window_params = [{transform_indices = @transform_0, window_bounds = array<i64: 1, 32, 64>}, {pipeline_mode = #tpu.pipeline_mode<synchronous>, transform_indices = @transform_1, window_bounds = array<i64: 32, 1>}, {pipeline_mode = #tpu.pipeline_mode<synchronous>, transform_indices = @transform_2, window_bounds = array<i64: 32, 1>}, {transform_indices = @transform_3, window_bounds = array<i64: 4, 32>}, {transform_indices = @transform_4, window_bounds = array<i64: 1, 4, 64>}]} {
    %c0_i32 = arith.constant 0 : i32
    %0 = arith.cmpi eq, %arg2, %c0_i32 : i32
    %1 = arith.extui %0 : i1 to i32
    %c0_i32_0 = arith.constant 0 : i32
    %2 = arith.cmpi ne, %1, %c0_i32_0 : i32
    scf.if %2 {
      %c0_7 = arith.constant 0 : index
      %c0_8 = arith.constant 0 : index
      %c0_9 = arith.constant 0 : index
      %9 = vector.load %arg3[%c0_7, %c0_8, %c0_9] : memref<1x32x64xf32, #tpu.memory_space<vmem>>, vector<1x32x64xf32>
      %10 = vector.shape_cast %9 : vector<1x32x64xf32> to vector<32x64xf32>
      %c0_10 = arith.constant 0 : index
      %c0_11 = arith.constant 0 : index
      %11 = vector.load %arg4[%c0_10, %c0_11] : memref<32x1xf32, #tpu.memory_space<vmem>>, vector<32x1xf32>
      %12 = vector.broadcast %11 : vector<32x1xf32> to vector<32x64xf32>
      %13 = arith.mulf %10, %12 : vector<32x64xf32>
      %c0_12 = arith.constant 0 : index
      %c0_13 = arith.constant 0 : index
      %14 = vector.load %arg5[%c0_12, %c0_13] : memref<32x1xf32, #tpu.memory_space<vmem>>, vector<32x1xf32>
      %15 = vector.broadcast %14 : vector<32x1xf32> to vector<32x64xf32>
      %16 = arith.addf %13, %15 : vector<32x64xf32>
      %cst_14 = arith.constant 0.000000e+00 : f32
      %17 = vector.broadcast %cst_14 : f32 to vector<32x64xf32>
      %18 = arith.maximumf %16, %17 : vector<32x64xf32>
      %c0_15 = arith.constant 0 : index
      %c0_16 = arith.constant 0 : index
      %19 = vector.load %arg8[%c0_15, %c0_16] : memref<32x64xf32, #tpu.memory_space<vmem>>, vector<32x64xf32>
      tpu.vector_store %arg8[%c0_15, %c0_16], %18 {strides = array<i32>} : memref<32x64xf32, #tpu.memory_space<vmem>>, vector<32x64xf32>,
    } else {
    }
    %c0 = arith.constant 0 : index
    %c0_1 = arith.constant 0 : index
    %3 = vector.load %arg6[%c0, %c0_1] : memref<4x32xf32, #tpu.memory_space<vmem>>, vector<4x32xf32>
    %c0_2 = arith.constant 0 : index
    %c0_3 = arith.constant 0 : index
    %4 = vector.load %arg8[%c0_2, %c0_3] : memref<32x64xf32, #tpu.memory_space<vmem>>, vector<32x64xf32>
    %cst = arith.constant dense<0.000000e+00> : vector<4x64xf32>
    %5 = tpu.matmul %3, %4, %cst {dimension_numbers = #tpu.dot_dimension_numbers<[1], [0], [0], [1], [0, 0, 1, 1], [], []>} : vector<4x32xf32>, vector<32x64xf32>, vector<4x64xf32> -> vector<4x64xf32>
    %c0_4 = arith.constant 0 : index
    %c0_5 = arith.constant 0 : index
    %c0_6 = arith.constant 0 : index
    %6 = vector.load %arg7[%c0_4, %c0_5, %c0_6] : memref<1x4x64xf32, #tpu.memory_space<vmem>>, vector<1x4x64xf32>
    %7 = vector.shape_cast %6 : vector<1x4x64xf32> to vector<4x64xf32>
    %8 = vector.shape_cast %5 : vector<4x64xf32> to vector<1x4x64xf32>
    tpu.vector_store %arg7[%c0_4, %c0_5, %c0_6], %8 {strides = array<i32>} : memref<1x4x64xf32, #tpu.memory_space<vmem>>, vector<1x4x64xf32>,
    return
  }
  func.func @transform_0(%arg0: i32, %arg1: i32, %arg2: i32) -> (i32, i32, i32) {
    %c0_i32 = arith.constant 0 : i32
    %c0_i32_0 = arith.constant 0 : i32
    return %arg0, %c0_i32, %arg1 : i32, i32, i32
  }
  func.func @transform_1(%arg0: i32, %arg1: i32, %arg2: i32) -> (i32, i32) {
    %c0_i32 = arith.constant 0 : i32
    %c0_i32_0 = arith.constant 0 : i32
    %c0_i32_1 = arith.constant 0 : i32
    return %c0_i32, %c0_i32_0 : i32, i32
  }
  func.func @transform_2(%arg0: i32, %arg1: i32, %arg2: i32) -> (i32, i32) {
    %c0_i32 = arith.constant 0 : i32
    %c0_i32_0 = arith.constant 0 : i32
    %c0_i32_1 = arith.constant 0 : i32
    return %c0_i32, %c0_i32_0 : i32, i32
  }
  func.func @transform_3(%arg0: i32, %arg1: i32, %arg2: i32) -> (i32, i32) {
    %c0_i32 = arith.constant 0 : i32
    %c0_i32_0 = arith.constant 0 : i32
    return %arg2, %c0_i32 : i32, i32
  }
  func.func @transform_4(%arg0: i32, %arg1: i32, %arg2: i32) -> (i32, i32, i32) {
    %c0_i32 = arith.constant 0 : i32
    return %arg0, %arg2, %arg1 : i32, i32, i32
  }
}

</mosaic_0001>

<bundles_post_ra>
// kernel: tile.18
= control target key start
LH: loop header
LB: loop body
LE: loop exit
PB: predicated region body
PF: predicated region fallthrough
CT: control target
= control target key end

     0   :  { %s22_s0 = inlined_call_operand.vmem [shape: f32[8], index: 0, kind: input, shape index: {}]   ;;  %s23_s1 = inlined_call_operand.vmem [shape: f32[4,8], index: 1, kind: output, shape index: {}]  }
   0x1   :  { %v4_v0 = vld [vmem:[%s22_s0] ss:$0 sm:$0xff] }
   0x2   :  { %5 = vst [vmem:[%s23_s1] sm:$0xf] %v4_v0 }

// kernel: tile.0
= control target key start
LH: loop header
LB: loop body
LE: loop exit
PB: predicated region body
PF: predicated region fallthrough
CT: control target
= control target key end

     0   :  { %s66_s8 = smov 125   ;;  %vm7_vm0 = vcmask 7168   ;;  %s67_s11 = smov 126   ;;  %s117_s0 = inlined_call_operand.vmem [shape: f32[4,8], index: 0, kind: input, shape index: {}]   ;;  %s118_s1 = inlined_call_operand.vmem [shape: f32[32,1], index: 1, kind: output, shape index: {}]  }
   0x1   :  { %v4_v0 = vld [vmem:[%s117_s0] sm:$0xf]  ;;  %s65_s0 = smov 127   ;;  %s68_s12 = smov 124  }
   0x2   :  { %5 = vst [vmem:[#allocation0] sm:$0xf] %v4_v0  ;;  %s69_s13 = smov 123   ;;  %s70_s14 = smov 122  }
   0x3   :  { %s71_s15 = smov 121  }
   0x9   :  { %v9_v1 = vld [vmem:[#allocation0] sm:$0xf]  }
   0xa   :  { %v21_v2 = vld [vmem:[#allocation0] sm:$0xf]   ;;  %10 = vrot.lane.b32.xlu0 %v9_v1, %s65_s0 }
   0xb   :  { %22 = vrot.lane.b32.xlu1 %v21_v2, %s66_s8  ;;  %v15_v3 = vld [vmem:[#allocation0] sm:$0xf]  }
   0xc   :  { %v27_v4 = vld [vmem:[#allocation0] sm:$0xf]  }
   0xd   :  { %v6_v5 = vld [vmem:[#allocation0] sm:$0xf]  }
   0xe   :  { %8 = vst.msk [vmem:[%s118_s1] ss:$8 sm:$0xf] %vm7_vm0, %v6_v5   ;;  %16 = vrot.lane.b32.xlu0 %v15_v3, %s67_s11  ;;  %v33_v6 = vld [vmem:[#allocation0] sm:$0xf]  }
   0xf   :  { %28 = vrot.lane.b32.xlu1 %v27_v4, %s68_s12  ;;  %v39_v7 = vld [vmem:[#allocation0] sm:$0xf]  }
  0x10   :  { %v45_v8 = vld [vmem:[#allocation0] sm:$0xf]  }
  0x12   :  { %34 = vrot.lane.b32.xlu0 %v33_v6, %s69_s13 }
  0x13   :  { %40 = vrot.lane.b32.xlu1 %v39_v7, %s70_s14 }
  0x16   :  { %46 = vrot.lane.b32.xlu0 %v45_v8, %s71_s15 }
  0x7c   :  { %v11_v9 = vpop.permute.xlu0 %10  }
  0x7d   :  { %v23_v10 = vpop.permute.xlu1 %22   ;;  %51 = vst.msk [vmem:[%s118_s1 + $0x1] ss:$8 sm:$0xf] %vm7_vm0, %v11_v9  }
  0x7e   :  { %53 = vst.msk [vmem:[%s118_s1 + $0x3] ss:$8 sm:$0xf] %vm7_vm0, %v23_v10  }
  0x80   :  { %v17_v11 = vpop.permute.xlu0 %16  }
  0x81   :  { %v29_v12 = vpop.permute.xlu1 %28   ;;  %52 = vst.msk [vmem:[%s118_s1 + $0x2] ss:$8 sm:$0xf] %vm7_vm0, %v17_v11  }
  0x82   :  { %54 = vst.msk [vmem:[%s118_s1 + $0x4] ss:$8 sm:$0xf] %vm7_vm0, %v29_v12  }
  0x84   :  { %v35_v13 = vpop.permute.xlu0 %34  }
  0x85   :  { %v41_v14 = vpop.permute.xlu1 %40   ;;  %55 = vst.msk [vmem:[%s118_s1 + $0x5] ss:$8 sm:$0xf] %vm7_vm0, %v35_v13  }
  0x86   :  { %56 = vst.msk [vmem:[%s118_s1 + $0x6] ss:$8 sm:$0xf] %vm7_vm0, %v41_v14  }
  0x88   :  { %v47_v15 = vpop.permute.xlu0 %46  }
  0x89   :  { %57 = vst.msk [vmem:[%s118_s1 + $0x7] ss:$8 sm:$0xf] %vm7_vm0, %v47_v15  }

// kernel: tile.29
= control target key start
LH: loop header
LB: loop body
LE: loop exit
PB: predicated region body
PF: predicated region fallthrough
CT: control target
= control target key end

     0   :  { %vm21_vm0 = vcmask 64512   ;;  %s56_s14 = smov 8   ;;  %s57_s15 = smov 16   ;;  %vm27_vm1 = vcmask 261312   ;;  %vm33_vm2 = vcmask 195712   ;;  %vm39_vm3 = vcmask 130112   ;;  %s83_s0 = inlined_call_operand.vmem [shape: f32[4,4,8], index: 0, kind: input, shape index: {}]   ;;  %s84_s1 = inlined_call_operand.vmem [shape: f32[4,32], index: 1, kind: output, shape index: {}]  }
   0x1   :  { %v49_v0 = vld [vmem:[%s83_s0 + $0xc] sm:$0xf]  ;;  %v50_v1 = vld [vmem:[%s83_s0 + $0x8] sm:$0xf]  ;;  %v51_v2 = vld [vmem:[%s83_s0 + $0x4] sm:$0xf] }
   0x2   :  { %8 = vst [vmem:[#allocation1 + $0x18] sm:$0xf] %v49_v0  ;;  %13 = vst [vmem:[#allocation1 + $0x10] sm:$0xf] %v50_v1  ;;  %v18_v3 = vld [vmem:[%s83_s0] sm:$0xf] }
   0x3   :  { %17 = vst [vmem:[#allocation1 + $0x8] sm:$0xf] %v51_v2  ;;  %19 = vst [vmem:[#allocation1] sm:$0xf] %v18_v3  ;;  %s55_s0 = smov 24  }
   0xa   :  { %v24_v4 = vld [vmem:[#allocation1 + $0x3] ss:$8 sm:$0xf]   ;;  %v36_v5 = vld [vmem:[#allocation1 + $0x1] ss:$8 sm:$0xf]  }
   0xb   :  { %25 = vrot.lane.b32.xlu0 %v24_v4, %s55_s0  ;;  %v20_v6 = vld [vmem:[#allocation1] ss:$8 sm:$0xf]   ;;  %v30_v7 = vld [vmem:[#allocation1 + $0x2] ss:$8 sm:$0xf]   ;;  %37 = vrot.lane.b32.xlu1 %v36_v5, %s56_s14 }
   0xc   :  { %22 = vst.msk [vmem:[#allocation0] sm:$0xf] %vm21_vm0, %v20_v6  }
   0xf   :  { %31 = vrot.lane.b32.xlu0 %v30_v7, %s57_s15 }
  0x7d   :  { %v26_v8 = vpop.permute.xlu0 %25   ;;  %v38_v9 = vpop.permute.xlu1 %37  }
  0x7e   :  { %28 = vst.msk [vmem:[#allocation0] sm:$0xf] %vm27_vm1, %v26_v8  }
  0x81   :  { %v32_v10 = vpop.permute.xlu0 %31  }
  0x82   :  { %34 = vst.msk [vmem:[#allocation0] sm:$0xf] %vm33_vm2, %v32_v10  }
  0x83   :  { %40 = vst.msk [vmem:[#allocation0] sm:$0xf] %vm39_vm3, %v38_v9  }
  0x8a   :  { %v44_v11 = vld [vmem:[#allocation0] sm:$0xf] }
  0x8b   :  { %46 = vst [vmem:[%s84_s1] sm:$0xf] %v44_v11 }

// kernel: transition_block_pallas.1
= control target key start
LH: loop header
LB: loop body
LE: loop exit
PB: predicated region body
PF: predicated region fallthrough
CT: control target
= control target key end

     0   :  { %s637_s15 = smov 0   ;;  %s639_s16 = smov 0   ;;  %s709_s0 = inlined_call_operand.vmem [shape: f32[2,32,64], index: 0, kind: input, shape index: {}]   ;;  %s710_s1 = inlined_call_operand.vmem [shape: f32[32,1], index: 1, kind: input, shape index: {}]   ;;  %s711_s2 = inlined_call_operand.vmem [shape: f32[32,1], index: 2, kind: input, shape index: {}]   ;;  %s712_s3 = inlined_call_operand.vmem [shape: f32[4,32], index: 3, kind: input, shape index: {}]   ;;  %s713_s4 = inlined_call_operand.vmem [shape: f32[2,4,64], index: 4, kind: output, shape index: {}]  }
   0x1   :  { %s641_s17 = smov 0  }
   0x2 LB: > { %s33_s18 = sadd.s32 1, %s602_s16  ;;  %p524_p0 = scmp.ge.s32.totalorder %s606_s17, 1  ;;  %s606_s17 = sphi %s641_s17, %s14_s17   ;;  %s602_s16 = sphi %s639_s16, %s715_s16   ;;  %s598_s15 = sphi %s637_s15, %s714_s15  }
   0x3   : > { %p35_p1 = scmp.ge.s32.totalorder %s33_s18, 2  ;;  %p199_p2 = scmp.lt.s32.totalorder %s606_s17, 3 }
   0x5   : > { %s717_s18 = smov (%p35_p1, %s33_s18), 0  ;;  %p200_p3 = pnand %p524_p0, %p199_p2 }
   0x6   : > { %v295_v0 = vld [vmem:[%s711_s2] sm:$0xff] (!%p200_p3)  ;;  %v608_v2 = vmov (!%p200_p3), 0   ;;  %v296_v3 = vld [vmem:[%s711_s2 + $0x8] sm:$0xff] (!%p200_p3)  ;;  %v270_v5 = vld [vmem:[%s710_s1 + $0x18] sm:$0xff] (!%p200_p3)  ;;  %v609_v9 = vmov (!%p200_p3), 0.0|0.0   ;;  %vm610_vm0 = vmmov (!%p200_p3), 0  }
   0x7   : > { %203 = sbr.rel (%p200_p3) target bundleno = 378 (0x17a), region = 36  ;;  %v267_v1 = vld [vmem:[%s710_s1] sm:$0xff] (!%p200_p3)  ;;  %583 = vset.pattern.permute.xlu1 (!%p200_p3), %v608_v2  ;;  %582 = vset.pattern.permute.xlu0 (!%p200_p3), %v608_v2  ;;  %v268_v4 = vld [vmem:[%s710_s1 + $0x8] sm:$0xff] (!%p200_p3)  ;;  %v269_v6 = vld [vmem:[%s710_s1 + $0x10] sm:$0xff] (!%p200_p3)  ;;  %v611_v10 = vmov (!%p200_p3), 0.0   ;;  %p237_p4 = scmp.lt.s32.totalorder (!%p200_p3), %s598_s15, 1 }
   0x8   : > { %301 = vperm.xlu1 (!%p200_p3), %583, %v295_v0   ;;  %273 = vperm.xlu0 (!%p200_p3), %582, %v267_v1   ;;  %v298_v7 = vld [vmem:[%s711_s2 + $0x18] sm:$0xff] (!%p200_p3)  ;;  %v297_v8 = vld [vmem:[%s711_s2 + $0x10] sm:$0xff] (!%p200_p3)  ;;  %vm327_vm1 = vcmask (!%p200_p3), 523264   ;;  %v332_v41 = vld [vmem:[%s712_s3] sm:$0xf] (!%p200_p3)  ;;  %vm337_vm2 = vcmask (!%p200_p3), 261120  }
   0x9   : > { %548 = vmatprep.subr.bf16.mxu0 (!%p200_p3), %v609_v9  ;;  %545 = vmatprep.mubr.msk.f32.mxu0 (!%p200_p3), %vm610_vm0, %v611_v10  ;;  %vm411_vm3 = vcmask (!%p200_p3), 519168  }
   0xc   : > { %306 = vperm.xlu1 (!%p200_p3), %583, %v296_v3   ;;  %278 = vperm.xlu0 (!%p200_p3), %582, %v268_v4  }
   0xe   : > { %s719_s15 = smov (!%p237_p4, %s598_s15), 1 }
   0xf   : > { %s531_s9 = sshll.u32 %s719_s15, 5  ;;  %s527_s19 = sshll.u32 %s719_s15, 2 }
  0x10   : > { %288 = vperm.xlu1 %583, %v270_v5   ;;  %283 = vperm.xlu0 %582, %v269_v6   ;;  %s244_s12 = scalar_lea.vmem %s709_s0, %s531_s9  ;;  %s258_s22 = scalar_lea.vmem %s713_s4, %s527_s19 }
  0x11   : > { %v263_v11 = vld [vmem:[%s244_s12] sm:$0xff]  ;;  %v264_v15 = vld [vmem:[%s244_s12 + $0x8] sm:$0xff]  ;;  %v266_v23 = vld [vmem:[%s244_s12 + $0x18] sm:$0xff] }
  0x12   : > { %v265_v25 = vld [vmem:[%s244_s12 + $0x10] sm:$0xff] }
  0x14   : > { %316 = vperm.xlu1 %583, %v298_v7   ;;  %311 = vperm.xlu0 %582, %v297_v8  }
  0x87   : > { %v302_v12 = vpop.permute.xlu1 %301  ;;  %v274_v13 = vpop.permute.xlu0 %273 }
  0x88   : > { %v291_v14 = vmul.f32 %v274_v13, %v263_v11 }
  0x8a   : > { %v319_v16 = vadd.f32 %v302_v12, %v291_v14 }
  0x8b   : > { %v307_v17 = vpop.permute.xlu1 %306  ;;  %v279_v18 = vpop.permute.xlu0 %278 }
  0x8c   : > { %v323_v19 = vmax.f32 %v319_v16, 0.0  ;;  %v292_v20 = vmul.f32 %v279_v18, %v264_v15 }
  0x8e   : > { %328 = vst.msk [vmem:[#allocation2] sm:$0xff] %vm327_vm1, %v323_v19  ;;  %v320_v21 = vadd.f32 %v307_v17, %v292_v20 }
  0x8f   : > { %v289_v22 = vpop.permute.xlu1 %288  ;;  %v284_v24 = vpop.permute.xlu0 %283 }
  0x90   : > { %v324_v26 = vmax.f32 %v320_v21, 0.0  ;;  %v294_v27 = vmul.f32 %v289_v22, %v266_v23  ;;  %v293_v28 = vmul.f32 %v284_v24, %v265_v25 }
  0x92   : > { %329 = vst.msk [vmem:[#allocation2 + $0x8] sm:$0xff] %vm327_vm1, %v324_v26 }
  0x93   : > { %v317_v29 = vpop.permute.xlu1 %316  ;;  %v312_v30 = vpop.permute.xlu0 %311 }
  0x94   : > { %v322_v31 = vadd.f32 %v317_v29, %v294_v27  ;;  %v321_v32 = vadd.f32 %v312_v30, %v293_v28 }
  0x95   : > { %v333_v35 = vld [vmem:[#allocation2] sm:$0xff] }
  0x96   : > { %v326_v33 = vmax.f32 %v322_v31, 0.0  ;;  %v325_v34 = vmax.f32 %v321_v32, 0.0 }
  0x98   : > { %331 = vst.msk [vmem:[#allocation2 + $0x18] sm:$0xff] %vm327_vm1, %v326_v33  ;;  %330 = vst.msk [vmem:[#allocation2 + $0x10] sm:$0xff] %vm327_vm1, %v325_v34 }
  0x99   : > { %v334_v36 = vld [vmem:[#allocation2 + $0x8] sm:$0xff] }
  0x9a   : > { %v549_v37 = vpack.c.bf16 %v334_v36, %v333_v35 }
  0x9c   : > { %550 = vmatpush3.bf16.msra.mxu0 %v549_v37 }
  0x9d   : > { %551 = vmatprep.subr.bf16.mxu0 %v609_v9 }
  0x9f   : > { %v335_v38 = vld [vmem:[#allocation2 + $0x10] sm:$0xff]  ;;  %v336_v39 = vld [vmem:[#allocation2 + $0x18] sm:$0xff] }
  0xa0   : > { %v552_v40 = vpack.c.bf16 %v336_v39, %v335_v38 }
  0xa2   : > { %553 = vmatpush3.bf16.msra.mxu0 %v552_v40 }
  0xa5   : > { %546 = vmatmul.mubr.msk.f32.vlgmr.msra.gmra.mrb[0].mxu0 %vm337_vm2, %v332_v41 }
 0x178   : > { %v407_v42 = vpop.f32.mrb[0].mxu0 }
 0x179   : > { %412 = vst.msk [vmem:[%s258_s22] sm:$0xf] %vm411_vm3, %v407_v42  ;;  %v547_v43 = vpop.f32.mrb[1].mxu0 }
 0x17a PF: > { %s14_s17 = sadd.s32 1, %s606_s17   ;;  %s714_s15 = smov %s602_s16 }
 0x17b   : > { %p11_p5 = scmp.ge.s32.totalorder %s14_s17, 4   ;;  %s715_s16 = smov %s717_s18 }
 0x17d   :  { %13 = sbr.rel (!%p11_p5) target bundleno = 2 (0x2), region = 73 }

</bundles_post_ra>
